<compile_context>
chip_gen: v7x
topology: tpu7x:2x2x1
jax: 0.10.0
libtpu: 0.0.40
codegen_flags: <defaults>
</compile_context>

<pallas_src>
import functools
import math

import jax
import jax.numpy as jnp
from jax import lax
from jax.experimental import pallas as pl
from jax.experimental.pallas import tpu as pltpu


def _embed_gather_kernel(ids_ref, table_hbm, out_ref, buf, sem, *, tile: int,
                         scale: float):
    o = pl.program_id(0)            # megacore split axis ("parallel")
    j = pl.program_id(1)            # token-tile index within this split ("arbitrary")
    n_inner = pl.num_programs(1)
    tile_idx = o * n_inner + j      # global token-tile index
    slot = j % 2

    def start_tile(which_tile, which_slot):
        base = which_tile * tile

        def issue(t, carry):
            row = ids_ref[base + t]
            pltpu.make_async_copy(
                table_hbm.at[pl.ds(row, 1), :],
                buf.at[pl.ds(which_slot * tile + t, 1), :],
                sem.at[which_slot],
            ).start()
            return carry

        lax.fori_loop(0, tile, issue, 0)

    def wait_tile(which_slot):
        def wait_one(t, carry):
            pltpu.make_async_copy(
                table_hbm.at[pl.ds(0, 1), :],
                buf.at[pl.ds(which_slot * tile + t, 1), :],
                sem.at[which_slot],
            ).wait()
            return carry

        lax.fori_loop(0, tile, wait_one, 0)

    # Prime the pipeline on the first tile of this core's chunk.
    @pl.when(j == 0)
    def _():
        start_tile(tile_idx, slot)

    # Prefetch the next tile's rows into the other slot while this tile is
    # consumed (manual double-buffering; scratch persists across grid steps).
    @pl.when(j + 1 < n_inner)
    def _():
        start_tile(tile_idx + 1, 1 - slot)

    wait_tile(slot)

    start = pl.multiple_of(slot * tile, 8)
    rows = buf[pl.ds(start, tile), :]
    out_ref[...] = (rows * scale).astype(out_ref.dtype)


def input_embedding(ids: jax.Array, table: jax.Array, *, tile: int | None = None) -> jax.Array:
    """Pallas equivalent of nn.Embedding(vocab, d_model)(ids) * sqrt(d_model)."""
    vocab_size, d_model = table.shape
    orig_shape = ids.shape
    scale = float(math.sqrt(d_model))

    flat_ids = jnp.clip(ids.reshape(-1).astype(jnp.int32), 0, vocab_size - 1)
    n_tokens = flat_ids.shape[0]
    itemsize = jnp.dtype(table.dtype).itemsize

    # Tokens per grid step: multiple of 8 (sublane-dense output blocks), capped
    # so 2x gather buffer + 2x output buffer stay well under v7x's 64 MiB VMEM.
    if tile is None:
        tile = min(256, max(8, -(-n_tokens // 8) * 8))
        max_tile = max(8, ((32 << 20) // (4 * d_model * itemsize)) // 8 * 8)
        tile = min(tile, max_tile)

    outer = 2  # megacore split: 2 TensorCores on v7x; harmless on v5e/v6e.
    chunk = outer * tile
    n_padded = -(-n_tokens // chunk) * chunk
    if n_padded != n_tokens:
        flat_ids = jnp.pad(flat_ids, (0, n_padded - n_tokens))
    n_inner = n_padded // chunk  # token tiles per outer split

    vmem_limit = int(min(48 << 20, max(16 << 20,
                                       4 * tile * d_model * itemsize + (4 << 20))))

    out = pl.pallas_call(
        functools.partial(_embed_gather_kernel, tile=tile, scale=scale),
        out_shape=jax.ShapeDtypeStruct((n_padded, d_model), table.dtype),
        grid_spec=pltpu.PrefetchScalarGridSpec(
            num_scalar_prefetch=1,
            grid=(outer, n_inner),
            in_specs=[
                # Table stays in HBM; rows are DMA'd manually inside the kernel.
                pl.BlockSpec(memory_space=pl.ANY),
            ],
            out_specs=pl.BlockSpec(
                (tile, d_model), lambda o, j, ids_ref: (o * n_inner + j, 0)
            ),
            scratch_shapes=[
                pltpu.VMEM((2 * tile, d_model), table.dtype),  # double-buffered gather tile
                pltpu.SemaphoreType.DMA((2,)),                 # one DMA sem per slot
            ],
        ),
        compiler_params=pltpu.CompilerParams(
            dimension_semantics=("parallel", "arbitrary"),
            vmem_limit_bytes=vmem_limit,
        ),
    )(flat_ids, table)

    return out[:n_tokens].reshape(*orig_shape, d_model)


if __name__ == "__main__":
    d_model = 128      # lane-dense last dim (multiple of 128)
    vocab_size = 64
    batch, seq = 2, 8

    key = jax.random.PRNGKey(0)
    k_emb, k_ids = jax.random.split(key)

    # nn.Embedding default init: weight ~ N(0, 1)
    embedding_table = jax.random.normal(k_emb, (vocab_size, d_model), dtype=jnp.float32)
    token_ids = jax.random.randint(k_ids, (batch, seq), 0, vocab_size, dtype=jnp.int32)

    out = input_embedding(token_ids, embedding_table)
    out = jax.block_until_ready(out)

    # Reference check (plain JAX).
    ref = jnp.take(embedding_table, token_ids, axis=0) * math.sqrt(d_model)
    assert out.shape == (batch, seq, d_model), out.shape
    assert jnp.allclose(out, ref, atol=1e-5, rtol=1e-5), float(jnp.max(jnp.abs(out - ref)))

    print("KERNEL_OK")
</pallas_src>

<mosaic_0001>
module attributes {stable_mosaic.version = 11 : i64} {
  func.func @_embed_gather_kernel(%arg0: i32, %arg1: i32, %arg2: memref<32xi32, #tpu.memory_space<smem>>, %arg3: memref<64x128xf32, #tpu.memory_space<any>>, %arg4: memref<16x128xf32, #tpu.memory_space<vmem>>, %arg5: memref<32x128xf32, #tpu.memory_space<vmem>>, %arg6: memref<2x!tpu.dma_semaphore, #tpu.memory_space<semaphore_mem>>) attributes {dimension_semantics = [#tpu.dimension_semantics<parallel>, #tpu.dimension_semantics<arbitrary>], iteration_bounds = array<i64: 2, 1>, scalar_prefetch = 1 : i64, scratch_operands = 2 : i64, tpu.core_type = #tpu.core_type<tc>, window_params = [{}, {transform_indices = @transform_1, window_bounds = array<i64: 16, 128>}]} {
    %c1_i32 = arith.constant 1 : i32
    %0 = arith.muli %arg0, %c1_i32 : i32
    %1 = arith.addi %0, %arg1 : i32
    %c2_i32 = arith.constant 2 : i32
    %c0_i32 = arith.constant 0 : i32
    %2 = arith.cmpi eq, %c2_i32, %c0_i32 : i32
    %c1_i32_0 = arith.constant 1 : i32
    %3 = arith.select %2, %c1_i32_0, %c2_i32 : i32
    %4 = arith.remsi %arg1, %3 : i32
    %c0_i32_1 = arith.constant 0 : i32
    %5 = arith.cmpi ne, %4, %c0_i32_1 : i32
    %c0_i32_2 = arith.constant 0 : i32
    %6 = arith.cmpi slt, %4, %c0_i32_2 : i32
    %c0_i32_3 = arith.constant 0 : i32
    %7 = arith.cmpi slt, %3, %c0_i32_3 : i32
    %8 = arith.xori %6, %7 : i1
    %9 = arith.andi %8, %5 : i1
    %10 = arith.addi %4, %3 : i32
    %11 = arith.select %9, %10, %4 : i32
    %c0_i32_4 = arith.constant 0 : i32
    %12 = arith.cmpi eq, %arg1, %c0_i32_4 : i32
    %13 = arith.extui %12 : i1 to i32
    %c0_i32_5 = arith.constant 0 : i32
    %14 = arith.cmpi ne, %13, %c0_i32_5 : i32
    scf.if %14 {
      %c16_i32_15 = arith.constant 16 : i32
      %27 = arith.muli %1, %c16_i32_15 : i32
      %c0_i32_16 = arith.constant 0 : i32
      %c16_i32_17 = arith.constant 16 : i32
      %28 = arith.addi %c0_i32_16, %c16_i32_17 : i32
      %c1_i32_18 = arith.constant 1 : i32
      scf.for %arg7 = %c0_i32_16 to %28 step %c1_i32_18  : i32 {
        %29 = arith.addi %27, %arg7 : i32
        %30 = arith.index_cast %29 : i32 to index
        %31 = memref.load %arg2[%30] : memref<32xi32, #tpu.memory_space<smem>>
        %c16_i32_20 = arith.constant 16 : i32
        %32 = arith.muli %11, %c16_i32_20 : i32
        %33 = arith.addi %32, %arg7 : i32
        %c0_i32_21 = arith.constant 0 : i32
        %34 = tpu.memref_slice %arg3[%31, %c0_i32_21] : memref<64x128xf32, #tpu.memory_space<any>> -> memref<1x128xf32, #tpu.memory_space<any>>
        %c0_i32_22 = arith.constant 0 : i32
        %35 = tpu.memref_slice %arg5[%33, %c0_i32_22] : memref<32x128xf32, #tpu.memory_space<vmem>> -> memref<1x128xf32, #tpu.memory_space<vmem>>
        %36 = tpu.memref_slice %arg6[%11] : memref<2x!tpu.dma_semaphore, #tpu.memory_space<semaphore_mem>> -> memref<1x!tpu.dma_semaphore, #tpu.memory_space<semaphore_mem>>
        %37 = tpu.memref_squeeze %36 : memref<1x!tpu.dma_semaphore, #tpu.memory_space<semaphore_mem>> -> memref<!tpu.dma_semaphore, #tpu.memory_space<semaphore_mem>>
        tpu.enqueue_dma source(%34 : memref<1x128xf32, #tpu.memory_space<any>>) target(%35 : memref<1x128xf32, #tpu.memory_space<vmem>>) target_semaphore(%37 : memref<!tpu.dma_semaphore, #tpu.memory_space<semaphore_mem>>)
      }
      %c16_i32_19 = arith.constant 16 : i32
    } else {
    }
    %c1_i32_6 = arith.constant 1 : i32
    %15 = arith.addi %arg1, %c1_i32_6 : i32
    %c1_i32_7 = arith.constant 1 : i32
    %16 = arith.cmpi slt, %15, %c1_i32_7 : i32
    %17 = arith.extui %16 : i1 to i32
    %c0_i32_8 = arith.constant 0 : i32
    %18 = arith.cmpi ne, %17, %c0_i32_8 : i32
    scf.if %18 {
      %c1_i32_15 = arith.constant 1 : i32
      %27 = arith.addi %1, %c1_i32_15 : i32
      %c1_i32_16 = arith.constant 1 : i32
      %28 = arith.subi %c1_i32_16, %11 : i32
      %c16_i32_17 = arith.constant 16 : i32
      %29 = arith.muli %27, %c16_i32_17 : i32
      %c0_i32_18 = arith.constant 0 : i32
      %c16_i32_19 = arith.constant 16 : i32
      %30 = arith.addi %c0_i32_18, %c16_i32_19 : i32
      %c1_i32_20 = arith.constant 1 : i32
      scf.for %arg7 = %c0_i32_18 to %30 step %c1_i32_20  : i32 {
        %31 = arith.addi %29, %arg7 : i32
        %32 = arith.index_cast %31 : i32 to index
        %33 = memref.load %arg2[%32] : memref<32xi32, #tpu.memory_space<smem>>
        %c16_i32_22 = arith.constant 16 : i32
        %34 = arith.muli %28, %c16_i32_22 : i32
        %35 = arith.addi %34, %arg7 : i32
        %c0_i32_23 = arith.constant 0 : i32
        %36 = tpu.memref_slice %arg3[%33, %c0_i32_23] : memref<64x128xf32, #tpu.memory_space<any>> -> memref<1x128xf32, #tpu.memory_space<any>>
        %c0_i32_24 = arith.constant 0 : i32
        %37 = tpu.memref_slice %arg5[%35, %c0_i32_24] : memref<32x128xf32, #tpu.memory_space<vmem>> -> memref<1x128xf32, #tpu.memory_space<vmem>>
        %38 = tpu.memref_slice %arg6[%28] : memref<2x!tpu.dma_semaphore, #tpu.memory_space<semaphore_mem>> -> memref<1x!tpu.dma_semaphore, #tpu.memory_space<semaphore_mem>>
        %39 = tpu.memref_squeeze %38 : memref<1x!tpu.dma_semaphore, #tpu.memory_space<semaphore_mem>> -> memref<!tpu.dma_semaphore, #tpu.memory_space<semaphore_mem>>
        tpu.enqueue_dma source(%36 : memref<1x128xf32, #tpu.memory_space<any>>) target(%37 : memref<1x128xf32, #tpu.memory_space<vmem>>) target_semaphore(%39 : memref<!tpu.dma_semaphore, #tpu.memory_space<semaphore_mem>>)
      }
      %c16_i32_21 = arith.constant 16 : i32
    } else {
    }
    %c0_i32_9 = arith.constant 0 : i32
    %c16_i32 = arith.constant 16 : i32
    %19 = arith.addi %c0_i32_9, %c16_i32 : i32
    %c1_i32_10 = arith.constant 1 : i32
    scf.for %arg7 = %c0_i32_9 to %19 step %c1_i32_10  : i32 {
      %c16_i32_15 = arith.constant 16 : i32
      %27 = arith.muli %11, %c16_i32_15 : i32
      %28 = arith.addi %27, %arg7 : i32
      %c0_i32_16 = arith.constant 0 : i32
      %c0_i32_17 = arith.constant 0 : i32
      %29 = tpu.memref_slice %arg3[%c0_i32_16, %c0_i32_17] : memref<64x128xf32, #tpu.memory_space<any>> -> memref<1x128xf32, #tpu.memory_space<any>>
      %c0_i32_18 = arith.constant 0 : i32
      %30 = tpu.memref_slice %arg5[%28, %c0_i32_18] : memref<32x128xf32, #tpu.memory_space<vmem>> -> memref<1x128xf32, #tpu.memory_space<vmem>>
      %31 = tpu.memref_slice %arg6[%11] : memref<2x!tpu.dma_semaphore, #tpu.memory_space<semaphore_mem>> -> memref<1x!tpu.dma_semaphore, #tpu.memory_space<semaphore_mem>>
      %32 = tpu.memref_squeeze %31 : memref<1x!tpu.dma_semaphore, #tpu.memory_space<semaphore_mem>> -> memref<!tpu.dma_semaphore, #tpu.memory_space<semaphore_mem>>
      tpu.wait_dma2 semaphore(%32 : memref<!tpu.dma_semaphore, #tpu.memory_space<semaphore_mem>>) src(%29 : memref<1x128xf32, #tpu.memory_space<any>>) dst(%30 : memref<1x128xf32, #tpu.memory_space<vmem>>)
    }
    %c16_i32_11 = arith.constant 16 : i32
    %c16_i32_12 = arith.constant 16 : i32
    %20 = arith.muli %11, %c16_i32_12 : i32
    %21 = tpu.assume_multiple %20, 8 : i32
    %22 = arith.index_cast %21 : i32 to index
    %c0 = arith.constant 0 : index
    %23 = vector.load %arg5[%22, %c0] : memref<32x128xf32, #tpu.memory_space<vmem>>, vector<16x128xf32>
    %cst = arith.constant 11.3137083 : f32
    %24 = vector.broadcast %cst : f32 to vector<16x128xf32>
    %25 = arith.mulf %23, %24 : vector<16x128xf32>
    %c0_13 = arith.constant 0 : index
    %c0_14 = arith.constant 0 : index
    %26 = vector.load %arg4[%c0_13, %c0_14] : memref<16x128xf32, #tpu.memory_space<vmem>>, vector<16x128xf32>
    tpu.vector_store %arg4[%c0_13, %c0_14], %25 {strides = array<i32>} : memref<16x128xf32, #tpu.memory_space<vmem>>, vector<16x128xf32>,
    return
  }
  func.func @transform_1(%arg0: i32, %arg1: i32, %arg2: memref<32xi32, #tpu.memory_space<smem>>) -> (i32, i32) {
    %c1_i32 = arith.constant 1 : i32
    %0 = arith.muli %arg0, %c1_i32 : i32
    %1 = arith.addi %0, %arg1 : i32
    %c0_i32 = arith.constant 0 : i32
    %c0_i32_0 = arith.constant 0 : i32
    return %1, %c0_i32 : i32, i32
  }
}

</mosaic_0001>

<bundles_post_ra>
// kernel: tpu_custom_call.1
= control target key start
LH: loop header
LB: loop body
LE: loop exit
PB: predicated region body
PF: predicated region fallthrough
CT: control target
= control target key end

     0   :  { %s619_s0 = inlined_call_operand.hbm [shape: s32[32], index: 0, kind: input, shape index: {}]   ;;  %s620_s1 = inlined_call_operand.hbm [shape: f32[64,128], index: 1, kind: input, shape index: {}]   ;;  %s621_s2 = inlined_call_operand.hbm [shape: f32[32,128], index: 2, kind: output, shape index: {}]  }
   0x1   :  { %s347_s11 = scalar_lea.hbm %s619_s0, 16 }
   0x2   :  { %p348_p0 = scmp.ne.s32.totalorder %s619_s0, %s347_s11  ;;  %p351_p1 = scmp.lt.u32.totalorder %s347_s11, %s619_s0 }
   0x4   :  { %p353_p2 = pnand %p351_p1, %p348_p0 }
   0x6   :  { %356 = shalt.err (!%p353_p2)  }
   0x7   :  { %s465_s16 = smov [#allocation5]  }
   0x8   :  { %8 = dma.hbm_to_smem %s619_s0, 16, %s465_s16, [#allocation4] }
   0x9   :  { %433 = dma.done.wait [#allocation4], 16 }
   0xa   :  { %434 = vsyncadd [#allocation4], 4294967280 }
   0xb   :  { %10 = sfence }
   0xc   :  { %11 = vsyncpa [#allocation7], 0 }
   0xd   :  { %13 = vsyncpa [#allocation7 + $0x1], 0  ;;  %s497_s19 = smov 0   ;;  %s499_s20 = smov 0  }
   0xe   :  { %s501_s21 = smov 0   ;;  %s503_s22 = smov 0  }
   0xf LB: > { %s28_s0 = sadd.s32 1, %s451_s21  ;;  %s268_s23 = sadd.s32 4294967295, %s455_s22   ;;  %s455_s22 = sphi %s503_s22, %s19_s22   ;;  %s451_s21 = sphi %s501_s21, %s627_s21   ;;  %s447_s20 = sphi %s499_s20, %s626_s20   ;;  %s443_s19 = sphi %s497_s19, %s625_s19  }
  0x10   : > { %p30_p3 = scmp.ge.s32.totalorder %s28_s0, 2  ;;  %p46_p4 = scmp.ne.s32.totalorder %s447_s20, %s443_s19 }
  0x11   : > { %s37_s24 = sadd.s32 1, %s447_s20  ;;  %p47_p5 = scmp.eq.s32.totalorder %s268_s23, 1 }
  0x12   : > { %s629_s0 = smov (%p30_p3, %s28_s0), 0  ;;  %p41_p6 = scmp.eq.s32.totalorder %s455_s22, 1 }
  0x13   : > { %s34_s25 = ssub.s32 %s451_s21, %s629_s0  ;;  %p527_p9 = por %p47_p5, %p46_p4 }
  0x14   : > { %p35_p7 = scmp.eq.s32.totalorder %s34_s25, 0  ;;  %p269_p8 = scmp.ne.s32.totalorder %s34_s25, 0 }
  0x15   : > { %s622_s26 = scalar_select %p527_p9, 1, 0 }
  0x16   : > { %s532_s27 = scalar_select %p35_p7, %s447_s20, %s37_s24  }
  0x17   : > { %p534_p10 = por %p269_p8, %p41_p6  ;;  %p270_p11 = scmp.ge.s32.totalorder %s455_s22, 2 }
  0x18   : > { %s61_s29 = sand.u32 (!%p270_p11), 1, %s447_s20   ;;  %s272_s30 = sshll.u32 (!%p270_p11), %s451_s21, 4 }
  0x19   : > { %56 = sbr.rel (%p270_p11) target bundleno = 101 (0x65), region = 12  ;;  %s271_s3 = sshll.u32 (!%p270_p11), %s61_s29, 4 }
  0x1a   : > { %s543_s4 = scalar_lea.vmem (!%p270_p11), [#allocation6], %s271_s3  ;;  %s545_s5 = smov (!%p270_p11), 0  }
  0x20 LB: >> { %s90_s6 = sadd.s32 %s459_s5, %s272_s30  ;;  %s96_s8 = scalar_lea.vmem [#allocation2], %s459_s5  ;;  %s459_s5 = sphi %s545_s5, %s89_s5  }
  0x21   : >> { %s91_s7 = sld [smem:[#allocation5 + %s90_s6]]  ;;  %s105_s9 = sshll.u32 %s96_s8, 4  ;;  %s106_s9 = int_to_ptr.vmem [resolvable:$true] %s105_s9 }
  0x22   : >> { %s359_s17 = scalar_lea.hbm %s620_s1, 1024 }
  0x27   : >> { %s273_s10 = sshll.u32 %s91_s7, 4 }
  0x28   : >> { %s95_s13 = scalar_lea.hbm %s620_s1, %s273_s10 }
  0x29   : >> { %s357_s14 = scalar_lea.hbm %s95_s13, 16  ;;  %p360_p13 = scmp.lt.u32.totalorder %s95_s13, %s620_s1 }
  0x2a   : >> { %p358_p12 = scmp.ne.s32.totalorder %s95_s13, %s357_s14  ;;  %p361_p0 = scmp.lt.u32.totalorder %s359_s17, %s357_s14 }
  0x2b   : >> { %p363_p2 = scmp.lt.u32.totalorder %s357_s14, %s95_s13 }
  0x2c   : >> { %p362_p1 = por %p361_p0, %p360_p13 }
  0x2e   : >> { %p364_p3 = por %p363_p2, %p362_p1 }
  0x30   : >> { %p365_p4 = pnand %p364_p3, %p358_p12 }
  0x32   : >> { %368 = shalt.err (!%p365_p4)  }
  0x33   : >> { %s369_s24 = scalar_lea.vmem %s106_s9, 16  ;;  %s466_s25 = smov [#allocation2]  }
  0x34   : >> { %p370_p5 = scmp.ne.s32.totalorder %s106_s9, %s369_s24  ;;  %s371_s3 = sshll.u32 %s466_s25, 4  ;;  %s372_s3 = int_to_ptr.vmem [resolvable:$false] %s371_s3 }
  0x35   : >> { %s373_s6 = scalar_lea.vmem %s372_s3, 512  ;;  %p374_p6 = scmp.lt.s32.totalorder %s106_s9, %s372_s3 }
  0x36   : >> { %p375_p7 = scmp.lt.s32.totalorder %s373_s6, %s369_s24 }
  0x38   : >> { %p376_p8 = por %p375_p7, %p374_p6 }
  0x3a   : >> { %p377_p11 = pnand %p376_p8, %p370_p5 }
  0x3c   : >> { %380 = shalt.err (!%p377_p11)  }
  0x3d   : >> { %108 = dma.hbm_to_vmem [thread:$0]  %s95_s13, 16, %s106_s9, [#allocation3] }
  0x3e   : >> { %s89_s5 = sadd.s32 1, %s459_s5  }
  0x3f   : >> { %p86_p9 = scmp.ge.s32.totalorder %s89_s5, 16  }
  0x40   : > { %s461_s7 = smov (%p86_p9), 0  }
  0x41   : > { %88 = sbr.rel (!%p86_p9) target bundleno = 32 (0x20), region = 90 }
  0x48 LB: >> { %435 = dma.done.wait [#allocation3], 16  ;;  %s463_s7 = sphi %s461_s7, %s147_s7  }
  0x49   : >> { %436 = vsyncadd [#allocation3], 4294967280  ;;  %s147_s7 = sadd.s32 1, %s463_s7  }
  0x4a   : >> { %p144_p12 = scmp.ge.s32.totalorder %s147_s7, 16  }
  0x4b   : > { %v154_v0 = vld [vmem:[#allocation2] sm:$0xff] (%p144_p12)  ;;  %v155_v1 = vld [vmem:[#allocation2 + $0x8] sm:$0xff] (%p144_p12)  ;;  %s288_s5 = sshll.u32 (%p144_p12), %s451_s21, 8  ;;  %s175_s10 = sshll.u32 (%p144_p12), %s543_s4, 4  ;;  %s573_s10 = int_to_ptr.vmem [resolvable:$true] %s175_s10 }
  0x4c   : > { %146 = sbr.rel (!%p144_p12) target bundleno = 72 (0x48), region = 112  ;;  %v156_v2 = vmul.f32 (%p144_p12), 11.313708, %v154_v0  ;;  %v157_v3 = vmul.f32 (%p144_p12), 11.313708, %v155_v1  ;;  %s570_s9 = scalar_lea.hbm (%p144_p12), %s621_s2, %s288_s5 }
  0x4d   : > { %s579_s11 = scalar_lea.sflag (%p144_p12), [#allocation7], %s61_s29  ;;  %s381_s12 = scalar_lea.vmem (%p144_p12), %s573_s10, 256 }
  0x4e   : > { %158 = vst [vmem:[%s543_s4] sm:$0xff] (%p144_p12), %v156_v2  ;;  %159 = vst [vmem:[%s543_s4 + $0x8] sm:$0xff] (%p144_p12), %v157_v3  ;;  %p382_p9 = scmp.ne.s32.totalorder (%p144_p12), %s573_s10, %s381_s12  ;;  %s467_s21 = smov (%p144_p12), [#allocation6]  }
  0x4f   : > { %s385_s13 = sshll.u32 (%p144_p12), %s467_s21, 4  ;;  %s386_s13 = int_to_ptr.vmem [resolvable:$false] %s385_s13 }
  0x50   : > { %p383_p13 = pnand (%p144_p12), %p382_p9, %p534_p10  ;;  %s387_s14 = scalar_lea.vmem (%p144_p12), %s386_s13, 512 }
  0x51   : > { %p388_p1 = scmp.lt.s32.totalorder (%p144_p12), %s573_s10, %s386_s13  ;;  %p389_p2 = scmp.lt.s32.totalorder (%p144_p12), %s387_s14, %s381_s12 }
  0x52   : > { %p384_p0 = pneg (%p144_p12), %p383_p13 }
  0x53   : > { %p390_p3 = por %p389_p2, %p388_p1 }
  0x55   : > { %p391_p4 = pnand %p390_p3, %p384_p0 }
  0x57   : > { %394 = shalt.err (!%p391_p4)
}
  0x58   : > { %s395_s29 = scalar_lea.hbm %s570_s9, 256  ;;  %s399_s16 = scalar_lea.hbm %s621_s2, 512 }
  0x59   : > { %p396_p5 = scmp.ne.s32.totalorder %s570_s9, %s395_s29  ;;  %p400_p8 = scmp.lt.u32.totalorder %s570_s9, %s621_s2 }
  0x5a   : > { %p401_p11 = scmp.lt.u32.totalorder %s399_s16, %s395_s29  ;;  %p403_p9 = scmp.lt.u32.totalorder %s395_s29, %s570_s9 }
  0x5b   : > { %p397_p6 = pnand %p396_p5, %p534_p10 }
  0x5c   : > { %p402_p12 = por %p401_p11, %p400_p8 }
  0x5d   : > { %p398_p7 = pneg %p397_p6 }
  0x5e   : > { %p404_p13 = por %p403_p9, %p402_p12 }
  0x60   : > { %p405_p0 = pnand %p404_p13, %p398_p7 }
  0x62   : > { %408 = shalt.err (!%p405_p0)
}
  0x63   : > { %s468_s23 = smov 128   ;;  %s469_s24 = smov 8  }
  0x64   : > { %289 = dma.vmem_to_hbm [thread:$0]  (%p534_p10), %s573_s10, 256, %s570_s9, %s579_s11, %s468_s23, %s468_s23, %s469_s24  }
  0x65 PF: > { %p295_p1 = scmp.ge.s32.totalorder %s455_s22, 1  ;;  %s190_s25 = sand.u32 1, %s443_s19  }
  0x66   : > { %p624_p2 = scmp.ne.s32.totalorder %s622_s26, 0  ;;  %s191_s3 = scalar_lea.sflag [#allocation7], %s190_s25 }
  0x68   : > { %p292_p3 = pnand %p295_p1, %p624_p2 }
  0x6a   : > { %438 = dma.done.wait (!%p292_p3), %s191_s3, 256  }
  0x6b   : > { %440 = vsyncadd (!%p292_p3), %s191_s3, 4294967040  ;;  %s19_s22 = sadd.s32 1, %s455_s22   ;;  %s625_s19 = smov %s447_s20 }
  0x6c   : > { %p16_p4 = scmp.ge.s32.totalorder %s19_s22, 3   ;;  %s626_s20 = smov %s532_s27 }
  0x6d   : > { %s627_s21 = smov %s629_s0 }
  0x6e   :  { %18 = sbr.rel (!%p16_p4) target bundleno = 15 (0xf), region = 123 }
  0x75   :  { %196 = vsyncpa [#allocation7], 1 }
  0x76   :  { %198 = vsyncpa [#allocation7 + $0x1], 1 }
  0x77   :  { %199 = vsyncmov [#allocation3] }
  0x7a   :  { %s200_s26 = vpop.sfrf %199 }
  0x7b   :  { %p282_p10 = scmp.ne.s32.totalorder %s200_s26, 0 }
  0x7d   :  { %204 = shalt.err (%p282_p10)  }
  0x7e   :  { %206 = vsyncmov [#allocation3 + $0x1] }
  0x81   :  { %s207_s28 = vpop.sfrf %206 }
  0x82   :  { %p283_p5 = scmp.ne.s32.totalorder %s207_s28, 0 }
  0x84   :  { %211 = shalt.err (%p283_p5)  }

</bundles_post_ra>
